<compile_context>
chip_gen: v7x
topology: tpu7x:2x2x1
jax: 0.10.0
libtpu: 0.0.40
codegen_flags: <defaults>
</compile_context>

<pallas_src>
import jax
import jax.numpy as jnp
from jax.experimental import pallas as pl
from jax.experimental.pallas import tpu as pltpu


# ---------------------------------------------------------------------------
# Kernel
# ---------------------------------------------------------------------------
def _disp_reg_kernel(x_ref, o_ref):
    """x_ref: (1, D, H_tile, W) cost block; o_ref: (1, 1, H_tile, W).

    out = sum_d x[:, d] * d  (f32 accumulate, low vreg footprint, no iota).
    """
    D = x_ref.shape[1]
    acc0 = jnp.zeros(o_ref.shape[2:], jnp.float32)

    def body(d, acc):
        # Per-slice load + upcast + scalar-weighted FMA; ~2-3 vregs live.
        return acc + x_ref[0, d, :, :].astype(jnp.float32) * d.astype(jnp.float32)

    acc = jax.lax.fori_loop(0, D, body, acc0, unroll=min(D, 8))
    o_ref[0, 0, :, :] = acc.astype(o_ref.dtype)


# ---------------------------------------------------------------------------
# Wrapper
# ---------------------------------------------------------------------------
def _choose_h_tile(D, H, W, itemsize, target_bytes):
    """Largest H tile (multiple of 8 dividing H, or full H) whose input block
    stays under `target_bytes`."""
    bytes_per_row = max(1, D * W * itemsize)
    max_rows = max(1, target_bytes // bytes_per_row)
    if H <= max_rows:
        return H
    t = (max_rows // 8) * 8
    while t >= 8:
        if H % t == 0:
            return t
        t -= 8
    # No legal multiple-of-8 divisor found: full extent is always legal.
    return H


def disparity_regression(cost_volume,
                         *,
                         target_block_bytes=4 << 20,
                         vmem_limit_bytes=32 << 20):
    """sum_d(cost_volume[:, d] * d), keepdim on dim 1.  NCHW in/out."""
    N, D, H, W = cost_volume.shape
    out_dtype = jnp.promote_types(cost_volume.dtype, jnp.float32)
    h_tile = _choose_h_tile(D, H, W, jnp.dtype(cost_volume.dtype).itemsize,
                            target_block_bytes)
    grid = (N, H // h_tile)

    return pl.pallas_call(
        _disp_reg_kernel,
        out_shape=jax.ShapeDtypeStruct((N, 1, H, W), out_dtype),
        grid=grid,
        in_specs=[pl.BlockSpec((1, D, h_tile, W), lambda n, h: (n, 0, h, 0))],
        out_specs=pl.BlockSpec((1, 1, h_tile, W), lambda n, h: (n, 0, h, 0)),
        compiler_params=pltpu.CompilerParams(
            dimension_semantics=("parallel", "parallel"),
            vmem_limit_bytes=vmem_limit_bytes,
        ),
    )(cost_volume)


class PredDispNet:
    """JAX/Pallas port of the PyTorch PredDispNet module."""

    # Fuse multiple cost volumes into one launch only when they are small
    # enough that the extra concatenate round trip is cheaper than the extra
    # kernel launches / pipeline warm-ups.
    _FUSE_TOTAL_BYTES = 64 << 20

    def __init__(self, maxdisp, strategy="softmax"):
        self.maxdisp = maxdisp
        self.strategy = strategy  # unused in forward, kept for parity

    def __call__(self, cost_volume1, cost_volume2=None, cost_volume3=None):
        inputs = [cost_volume1, cost_volume2, cost_volume3]
        present = [i for i, v in enumerate(inputs) if v is not None]
        vols = [inputs[i] for i in present]
        for v in vols:
            assert v.shape[1] == self.maxdisp

        same_shape = all(v.shape == vols[0].shape and v.dtype == vols[0].dtype
                         for v in vols)
        total_bytes = sum(v.size * jnp.dtype(v.dtype).itemsize for v in vols)

        if len(vols) > 1 and same_shape and total_bytes <= self._FUSE_TOTAL_BYTES:
            # Single launch over the stacked batch axis.
            stacked = jnp.concatenate(vols, axis=0)
            out = disparity_regression(stacked)
            n = vols[0].shape[0]
            outs = [out[k * n:(k + 1) * n] for k in range(len(vols))]
        else:
            outs = [disparity_regression(v) for v in vols]

        preds = [None, None, None]
        for idx, o in zip(present, outs):
            preds[idx] = o
        return tuple(preds)


# ---------------------------------------------------------------------------
# Self-test
# ---------------------------------------------------------------------------
if __name__ == "__main__":
    key = jax.random.PRNGKey(0)
    N, maxdisp, H, W = 2, 4, 16, 16

    k1, k2, k3 = jax.random.split(key, 3)
    cv1 = jax.random.uniform(k1, (N, maxdisp, H, W), dtype=jnp.float32)
    cv2 = jax.random.uniform(k2, (N, maxdisp, H, W), dtype=jnp.float32)
    cv3 = jax.random.uniform(k3, (N, maxdisp, H, W), dtype=jnp.float32)

    model = PredDispNet(maxdisp)

    # Fused path (all three volumes, one launch).
    pred1, pred2, pred3 = model(cv1, cv2, cv3)
    jax.block_until_ready((pred1, pred2, pred3))

    # Single-volume path as well.
    only1, none2, none3 = model(cv1)
    jax.block_until_ready(only1)
    assert none2 is None and none3 is None

    # Reference check in plain JAX.
    disp = jnp.arange(maxdisp, dtype=jnp.float32).reshape(1, maxdisp, 1, 1)
    for pred, cv in ((pred1, cv1), (pred2, cv2), (pred3, cv3), (only1, cv1)):
        ref = jnp.sum(cv * disp, axis=1, keepdims=True)
        assert pred.shape == (N, 1, H, W)
        assert jnp.allclose(pred, ref, atol=1e-5, rtol=1e-5)

    print("KERNEL_OK")
</pallas_src>

<mosaic_0001>
module attributes {stable_mosaic.version = 11 : i64} {
  func.func @_disp_reg_kernel(%arg0: i32, %arg1: i32, %arg2: memref<1x4x16x16xf32, #tpu.memory_space<vmem>>, %arg3: memref<1x1x16x16xf32, #tpu.memory_space<vmem>>) attributes {dimension_semantics = [#tpu.dimension_semantics<parallel>, #tpu.dimension_semantics<parallel>], iteration_bounds = array<i64: 6, 1>, scalar_prefetch = 0 : i64, scratch_operands = 0 : i64, tpu.core_type = #tpu.core_type<tc>, window_params = [{transform_indices = @transform_0, window_bounds = array<i64: 1, 4, 16, 16>}, {transform_indices = @transform_1, window_bounds = array<i64: 1, 1, 16, 16>}]} {
    %cst = arith.constant 0.000000e+00 : f32
    %0 = vector.broadcast %cst : f32 to vector<16x16xf32>
    %c0_i32 = arith.constant 0 : i32
    %c0 = arith.constant 0 : index
    %1 = arith.index_cast %c0_i32 : i32 to index
    %c0_0 = arith.constant 0 : index
    %c0_1 = arith.constant 0 : index
    %2 = vector.load %arg2[%c0, %1, %c0_0, %c0_1] : memref<1x4x16x16xf32, #tpu.memory_space<vmem>>, vector<1x1x16x16xf32>
    %3 = vector.shape_cast %2 : vector<1x1x16x16xf32> to vector<16x16xf32>
    %4 = arith.sitofp %c0_i32 : i32 to f32
    %5 = vector.broadcast %4 : f32 to vector<16x16xf32>
    %6 = arith.mulf %3, %5 : vector<16x16xf32>
    %7 = arith.addf %0, %6 : vector<16x16xf32>
    %c1_i32 = arith.constant 1 : i32
    %c0_2 = arith.constant 0 : index
    %8 = arith.index_cast %c1_i32 : i32 to index
    %c0_3 = arith.constant 0 : index
    %c0_4 = arith.constant 0 : index
    %9 = vector.load %arg2[%c0_2, %8, %c0_3, %c0_4] : memref<1x4x16x16xf32, #tpu.memory_space<vmem>>, vector<1x1x16x16xf32>
    %10 = vector.shape_cast %9 : vector<1x1x16x16xf32> to vector<16x16xf32>
    %11 = arith.sitofp %c1_i32 : i32 to f32
    %12 = vector.broadcast %11 : f32 to vector<16x16xf32>
    %13 = arith.mulf %10, %12 : vector<16x16xf32>
    %14 = arith.addf %7, %13 : vector<16x16xf32>
    %c2_i32 = arith.constant 2 : i32
    %c0_5 = arith.constant 0 : index
    %15 = arith.index_cast %c2_i32 : i32 to index
    %c0_6 = arith.constant 0 : index
    %c0_7 = arith.constant 0 : index
    %16 = vector.load %arg2[%c0_5, %15, %c0_6, %c0_7] : memref<1x4x16x16xf32, #tpu.memory_space<vmem>>, vector<1x1x16x16xf32>
    %17 = vector.shape_cast %16 : vector<1x1x16x16xf32> to vector<16x16xf32>
    %18 = arith.sitofp %c2_i32 : i32 to f32
    %19 = vector.broadcast %18 : f32 to vector<16x16xf32>
    %20 = arith.mulf %17, %19 : vector<16x16xf32>
    %21 = arith.addf %14, %20 : vector<16x16xf32>
    %c3_i32 = arith.constant 3 : i32
    %c0_8 = arith.constant 0 : index
    %22 = arith.index_cast %c3_i32 : i32 to index
    %c0_9 = arith.constant 0 : index
    %c0_10 = arith.constant 0 : index
    %23 = vector.load %arg2[%c0_8, %22, %c0_9, %c0_10] : memref<1x4x16x16xf32, #tpu.memory_space<vmem>>, vector<1x1x16x16xf32>
    %24 = vector.shape_cast %23 : vector<1x1x16x16xf32> to vector<16x16xf32>
    %25 = arith.sitofp %c3_i32 : i32 to f32
    %26 = vector.broadcast %25 : f32 to vector<16x16xf32>
    %27 = arith.mulf %24, %26 : vector<16x16xf32>
    %28 = arith.addf %21, %27 : vector<16x16xf32>
    %c4_i32 = arith.constant 4 : i32
    %c0_11 = arith.constant 0 : index
    %c0_12 = arith.constant 0 : index
    %c0_13 = arith.constant 0 : index
    %c0_14 = arith.constant 0 : index
    %29 = vector.load %arg3[%c0_11, %c0_12, %c0_13, %c0_14] : memref<1x1x16x16xf32, #tpu.memory_space<vmem>>, vector<1x1x16x16xf32>
    %30 = vector.shape_cast %29 : vector<1x1x16x16xf32> to vector<16x16xf32>
    %31 = vector.shape_cast %28 : vector<16x16xf32> to vector<1x1x16x16xf32>
    tpu.vector_store %arg3[%c0_11, %c0_12, %c0_13, %c0_14], %31 {strides = array<i32>} : memref<1x1x16x16xf32, #tpu.memory_space<vmem>>, vector<1x1x16x16xf32>,
    return
  }
  func.func @transform_0(%arg0: i32, %arg1: i32) -> (i32, i32, i32, i32) {
    %c0_i32 = arith.constant 0 : i32
    %c0_i32_0 = arith.constant 0 : i32
    %c0_i32_1 = arith.constant 0 : i32
    return %arg0, %c0_i32, %arg1, %c0_i32_0 : i32, i32, i32, i32
  }
  func.func @transform_1(%arg0: i32, %arg1: i32) -> (i32, i32, i32, i32) {
    %c0_i32 = arith.constant 0 : i32
    %c0_i32_0 = arith.constant 0 : i32
    %c0_i32_1 = arith.constant 0 : i32
    return %arg0, %c0_i32, %arg1, %c0_i32_0 : i32, i32, i32, i32
  }
}

</mosaic_0001>

<bundles_post_ra>
// kernel: tpu_custom_call.1
= control target key start
LH: loop header
LB: loop body
LE: loop exit
PB: predicated region body
PF: predicated region fallthrough
CT: control target
= control target key end

     0   :  { %6 = vsyncpa [#allocation3], 0  ;;  %s679_s0 = inlined_call_operand.hbm [shape: f32[6,4,16,16], index: 0, kind: input, shape index: {}]   ;;  %s680_s1 = inlined_call_operand.hbm [shape: f32[6,1,16,16], index: 1, kind: output, shape index: {}]  }
   0x1   :  { %8 = vsyncpa [#allocation3 + $0x1], 0 }
   0x2   :  { %9 = vsyncpa [#allocation4], 0 }
   0x3   :  { %11 = vsyncpa [#allocation4 + $0x1], 0  ;;  %s505_s6 = smov 0   ;;  %s507_s7 = smov 0  }
   0x4   :  { %s509_s8 = smov 0   ;;  %s511_s9 = smov 0  }
   0x5   :  { %s513_s10 = smov 0   ;;  %s515_s11 = smov 0  }
   0x6 LB: > { %s286_s12 = sadd.s32 4294967295, %s487_s11   ;;  %s287_s13 = sadd.s32 4294967294, %s487_s11   ;;  %s487_s11 = sphi %s515_s11, %s17_s11   ;;  %s483_s10 = sphi %s513_s10, %s694_s10   ;;  %s479_s9 = sphi %s511_s9, %s693_s9   ;;  %s475_s8 = sphi %s509_s8, %s692_s8   ;;  %s471_s7 = sphi %s507_s7, %s691_s7   ;;  %s467_s6 = sphi %s505_s6, %s690_s6  }
   0x7   : > { %s29_s14 = sadd.s32 1, %s483_s10  ;;  %s38_s15 = sadd.s32 1, %s475_s8 }
   0x8   : > { %p31_p0 = scmp.ge.s32.totalorder %s29_s14, 6  ;;  %p45_p1 = scmp.ne.s32.totalorder %s475_s8, %s471_s7 }
   0x9   : > { %p46_p2 = scmp.eq.s32.totalorder %s487_s11, 0  ;;  %p51_p3 = scmp.ne.s32.totalorder %s471_s7, %s467_s6 }
   0xa   : > { %s696_s14 = smov (%p31_p0, %s29_s14), 0  ;;  %p52_p5 = scmp.eq.s32.totalorder %s286_s12, 0 }
   0xb   : > { %p546_p4 = por %p46_p2, %p45_p1  ;;  %s33_s17 = ssub.s32 %s483_s10, %s696_s14 }
   0xc   : > { %p77_p6 = scmp.eq.s32.totalorder %s286_s12, 5  ;;  %p36_p7 = scmp.eq.s32.totalorder %s33_s17, 0 }
   0xd   : > { %p552_p8 = por %p52_p5, %p51_p3  ;;  %p83_p10 = scmp.eq.s32.totalorder %s287_s13, 5 }
   0xe   : > { %p556_p9 = por %p77_p6, %p45_p1  ;;  %p321_p12 = scmp.lt.s32.totalorder %s487_s11, 6 }
   0xf   : > { %s561_s20 = scalar_select %p36_p7, %s475_s8, %s38_s15  }
  0x10   : > { %s684_s19 = scalar_select %p556_p9, 1, 0 }
  0x11   : > { %p563_p11 = por %p83_p10, %p51_p3  ;;  %s103_s22 = sand.u32 1, %s475_s8  }
  0x12   : > { %s290_s23 = sshll.u32 %s103_s22, 6  ;;  %s307_s24 = sshll.u32 %s483_s10, 10 }
  0x13   : > { %s685_s21 = scalar_select %p563_p11, 1, 0 }
  0x14   : > { %s573_s27 = scalar_lea.hbm %s679_s0, %s307_s24  ;;  %s107_s28 = scalar_lea.vmem [#allocation2], %s290_s23 }
  0x15   : > { %s116_s29 = sshll.u32 %s107_s28, 4  ;;  %p579_p13 = pnand %p321_p12, %p546_p4  ;;  %s575_s29 = int_to_ptr.vmem [resolvable:$true] %s116_s29 }
  0x16   : > { %s584_s2 = scalar_lea.sflag [#allocation3], %s103_s22  ;;  %s375_s3 = scalar_lea.hbm %s573_s27, 1024 }
  0x17   : > { %p376_p1 = scmp.ne.s32.totalorder %s573_s27, %s375_s3  ;;  %p377_p2 = pneg %p579_p13 }
  0x18   : > { %s380_s12 = scalar_lea.hbm %s679_s0, 6144  ;;  %p381_p4 = scmp.lt.u32.totalorder %s573_s27, %s679_s0 }
  0x19   : > { %p378_p3 = pnand %p377_p2, %p376_p1  ;;  %p382_p6 = scmp.lt.u32.totalorder %s380_s12, %s375_s3 }
  0x1a   : > { %p384_p10 = scmp.lt.u32.totalorder %s375_s3, %s573_s27 }
  0x1b   : > { %p379_p5 = pneg %p378_p3  ;;  %p383_p7 = por %p382_p6, %p381_p4 }
  0x1d   : > { %p385_p12 = por %p384_p10, %p383_p7 }
  0x1f   : > { %p386_p0 = pnand %p385_p12, %p379_p5 }
  0x21   : > { %389 = shalt.err (!%p386_p0)
}
  0x22   : > { %s390_s16 = scalar_lea.vmem %s575_s29, 1024  ;;  %s489_s17 = smov [#allocation2]  }
  0x23   : > { %p391_p1 = scmp.ne.s32.totalorder %s575_s29, %s390_s16  ;;  %s395_s22 = sshll.u32 %s489_s17, 4  ;;  %s396_s22 = int_to_ptr.vmem [resolvable:$false] %s395_s22 }
  0x24   : > { %s397_s23 = scalar_lea.vmem %s396_s22, 2048  ;;  %p398_p9 = scmp.lt.s32.totalorder %s575_s29, %s396_s22 }
  0x25   : > { %p393_p3 = pnand %p391_p1, %p377_p2  ;;  %p399_p4 = scmp.lt.s32.totalorder %s397_s23, %s390_s16 }
  0x27   : > { %p394_p11 = pneg %p393_p3  ;;  %p400_p6 = por %p399_p4, %p398_p9 }
  0x29   : > { %p401_p7 = pnand %p400_p6, %p394_p11 }
  0x2b   : > { %404 = shalt.err (!%p401_p7)
}
  0x2c   : > { %s490_s24 = smov 128   ;;  %s491_s25 = smov 8  }
  0x2d   : > { %316 = dma.hbm_to_vmem [thread:$0]  (!%p579_p13), %s573_s27, 1024, %s575_s29, %s584_s2, %s490_s24, %s490_s24, %s491_s25  }
  0x2e   : > { %p124_p0 = scmp.lt.s32.totalorder %s487_s11, 7  ;;  %p687_p2 = scmp.ge.s32.totalorder %s487_s11, 1 }
  0x30   : > { %p125_p5 = pnand %p687_p2, %p124_p0 }
  0x31   : > { %s616_s26 = sand.u32 (!%p125_p5), 1, %s471_s7  }
  0x32   : > { %128 = sbr.rel (%p125_p5) target bundleno = 86 (0x56), region = 24  ;;  %s294_s28 = sshll.u32 (!%p125_p5), %s616_s26, 6 }
  0x33   : > { %s131_s3 = scalar_lea.sflag (!%p125_p5), [#allocation3], %s616_s26  ;;  %s134_s4 = scalar_lea.vmem (!%p125_p5), [#allocation2], %s294_s28 }
  0x39   : > { %458 = dma.done.wait (%p552_p8), %s131_s3, 1024  }
  0x3a   : > { %460 = vsyncadd (%p552_p8), %s131_s3, 4294966272  ;;  %s295_s27 = sshll.u32 %s616_s26, 4  ;;  %v155_v0 = vld [vmem:[%s134_s4] sm:$0xff]  ;;  %v296_v1 = vld [vmem:[%s134_s4 + $0x10] sm:$0xff]  ;;  %s308_s30 = sshll.u32 %s479_s9, 8  ;;  %vm180_vm0 = vcmask 130048  }
  0x3b   : > { %v298_v2 = vld [vmem:[%s134_s4 + $0x20] sm:$0xff]  ;;  %v157_v3 = vmul.f32 0.0, %v155_v0  ;;  %v300_v5 = vld [vmem:[%s134_s4 + $0x30] sm:$0xff]  ;;  %v156_v6 = vld [vmem:[%s134_s4 + $0x8] sm:$0xff]  ;;  %s152_s18 = scalar_lea.vmem [#allocation5], %s295_s27  ;;  %s631_s12 = scalar_lea.hbm %s680_s1, %s308_s30 }
  0x3c   : > { %v169_v4 = vmul.f32 2.0, %v298_v2  ;;  %v297_v7 = vld [vmem:[%s134_s4 + $0x18] sm:$0xff]  ;;  %v158_v8 = vmul.f32 0.0, %v156_v6  ;;  %v299_v9 = vld [vmem:[%s134_s4 + $0x28] sm:$0xff]  ;;  %v176_v12 = vmul.f32 3.0, %v300_v5  ;;  %s199_s29 = sshll.u32 %s152_s18, 4  ;;  %s626_s29 = int_to_ptr.vmem [resolvable:$true] %s199_s29 }
  0x3d   : > { %v301_v10 = vld [vmem:[%s134_s4 + $0x38] sm:$0xff]  ;;  %v164_v11 = vadd.f32 %v296_v1, %v157_v3  ;;  %v170_v13 = vmul.f32 2.0, %v299_v9  ;;  %s184_s13 = scalar_lea.sflag [#allocation4], %s616_s26  ;;  %s405_s15 = scalar_lea.vmem %s626_s29, 256 }
  0x3e   : > { %v165_v14 = vadd.f32 %v297_v7, %v158_v8  ;;  %v177_v15 = vmul.f32 3.0, %v301_v10  ;;  %p406_p8 = scmp.ne.s32.totalorder %s626_s29, %s405_s15  ;;  %p688_p9 = scmp.ne.s32.totalorder %s684_s19, 0 }
  0x3f   : > { %v171_v16 = vadd.f32 %v169_v4, %v164_v11  ;;  %s492_s9 = smov [#allocation5]  }
  0x40   : > { %v172_v17 = vadd.f32 %v170_v13, %v165_v14  ;;  %p407_p11 = pnand %p406_p8, %p688_p9  ;;  %s409_s16 = sshll.u32 %s492_s9, 4  ;;  %s410_s16 = int_to_ptr.vmem [resolvable:$false] %s409_s16 }
  0x41   : > { %v178_v18 = vadd.f32 %v176_v12, %v171_v16  ;;  %s411_s17 = scalar_lea.vmem %s410_s16, 512  ;;  %p412_p10 = scmp.lt.s32.totalorder %s626_s29, %s410_s16 }
  0x42   : > { %v179_v19 = vadd.f32 %v177_v15, %v172_v17  ;;  %p408_p13 = pneg %p407_p11  ;;  %p413_p12 = scmp.lt.s32.totalorder %s411_s17, %s405_s15 }
  0x43   : > { %181 = vst.msk [vmem:[%s152_s18] sm:$0xff] %vm180_vm0, %v178_v18 }
  0x44   : > { %182 = vst.msk [vmem:[%s152_s18 + $0x8] sm:$0xff] %vm180_vm0, %v179_v19  ;;  %p414_p1 = por %p413_p12, %p412_p10 }
  0x46   : > { %p415_p3 = pnand %p414_p1, %p408_p13 }
  0x48   : > { %418 = shalt.err (!%p415_p3)
}
  0x49   : > { %s419_s22 = scalar_lea.hbm %s631_s12, 256  ;;  %s423_s25 = scalar_lea.hbm %s680_s1, 1536 }
  0x4a   : > { %p420_p4 = scmp.ne.s32.totalorder %s631_s12, %s419_s22  ;;  %p424_p0 = scmp.lt.u32.totalorder %s631_s12, %s680_s1 }
  0x4b   : > { %p425_p2 = scmp.lt.u32.totalorder %s423_s25, %s419_s22  ;;  %p427_p8 = scmp.lt.u32.totalorder %s419_s22, %s631_s12 }
  0x4c   : > { %p421_p6 = pnand %p420_p4, %p688_p9 }
  0x4d   : > { %p426_p5 = por %p425_p2, %p424_p0 }
  0x4e   : > { %p422_p7 = pneg %p421_p6 }
  0x4f   : > { %p428_p11 = por %p427_p8, %p426_p5 }
  0x51   : > { %p429_p13 = pnand %p428_p11, %p422_p7 }
  0x53   : > { %432 = shalt.err (!%p429_p13)
}
  0x54   : > { %s493_s4 = smov 128   ;;  %s494_s27 = smov 8  }
  0x55   : > { %311 = dma.vmem_to_hbm [thread:$0]  (%p688_p9), %s626_s29, 256, %s631_s12, %s184_s13, %s493_s4, %s493_s4, %s494_s27  }
  0x56 PF: > { %p322_p10 = scmp.ge.s32.totalorder %s487_s11, 2  ;;  %s214_s18 = sand.u32 1, %s467_s6  }
  0x57   : > { %p689_p12 = scmp.ne.s32.totalorder %s685_s21, 0  ;;  %s215_s30 = scalar_lea.sflag [#allocation4], %s214_s18 }
  0x59   : > { %p318_p1 = pnand %p322_p10, %p689_p12 }
  0x5b   : > { %462 = dma.done.wait (!%p318_p1), %s215_s30, 256  }
  0x5c   : > { %464 = vsyncadd (!%p318_p1), %s215_s30, 4294967040  ;;  %s17_s11 = sadd.s32 1, %s487_s11   ;;  %s690_s6 = smov %s471_s7 }
  0x5d   : > { %p14_p3 = scmp.ge.s32.totalorder %s17_s11, 8   ;;  %s691_s7 = smov %s475_s8 }
  0x5e   : > { %s692_s8 = smov %s561_s20  ;;  %s693_s9 = smov %s483_s10 }
  0x5f   : > { %s694_s10 = smov %s696_s14  ;;  %16 = sbr.rel (!%p14_p3) target bundleno = 6 (0x6), region = 72 }
  0x66   :  { %220 = vsyncpa [#allocation3], 1 }
  0x67   :  { %222 = vsyncpa [#allocation3 + $0x1], 1 }
  0x68   :  { %223 = vsyncpa [#allocation4], 1 }
  0x69   :  { %225 = vsyncpa [#allocation4 + $0x1], 1 }

</bundles_post_ra>
